<compile_context>
chip_gen: v7x
topology: tpu7x:2x2x1
jax: 0.10.0
libtpu: 0.0.40
codegen_flags: <defaults>
</compile_context>

<pallas_src>
import functools

import numpy as np
import jax
import jax.numpy as jnp
from jax.experimental import pallas as pl
from jax.experimental.pallas import tpu as pltpu


def _rff_kernel(sigma_ref, x_ref, w_ref, out_ref, *, d_out, out_scale):
    # sigma lives in SMEM (scalar parameter); x/w/out tiles live in VMEM.
    inv_sigma = 1.0 / sigma_ref[0]
    # MXU matmul on the raw weight; fold the scalar 1/sigma into the small
    # [tm, d_out] result (not the [d_in, d_out] weight) each step.
    wx = jnp.dot(x_ref[...], w_ref[...], preferred_element_type=jnp.float32)
    wx = wx * inv_sigma
    # cos half then sin half, matching torch.cat(..., dim=-1).
    # Both stores are lane-dense when d_out % 128 == 0.
    out_ref[:, :d_out] = (out_scale * jnp.cos(wx)).astype(out_ref.dtype)
    out_ref[:, d_out:] = (out_scale * jnp.sin(wx)).astype(out_ref.dtype)


def _choose_tm(N, d_in, d_out, *, tm_max=512, vmem_budget=40 * 1024 * 1024):
    """Row tile: multiple of 8 (f32 sublanes), <= tm_max, no larger than the
    padded batch, and small enough that the double-buffered x / out tiles plus
    the resident weight fit a conservative VMEM budget (v7x has 64 MiB/TC)."""
    n_padded_min = max(8, ((N + 7) // 8) * 8)
    tm = min(tm_max, n_padded_min)
    tm = max(8, (tm // 8) * 8)

    w_bytes = d_in * d_out * 4  # resident weight (f32)

    def est(t):
        # 2x double-buffered x tile + 2x double-buffered output tile + weight.
        return w_bytes + 2 * t * d_in * 4 + 2 * t * (2 * d_out) * 4

    while tm > 8 and est(tm) > vmem_budget:
        tm = max(8, ((tm // 2) // 8) * 8)
    return tm


def rff_layer_forward(x, weight, sigma, *, tm_max=512):
    """Pallas implementation of RFF_layer.forward (variant='cosine_sine').

    x:      [N, d_in]      float32
    weight: [d_in, d_out]  float32
    sigma:  [1]            float32 (scalar parameter)
    returns [N, 2*d_out]   float32   ([cos | sin] along last dim)
    """
    N, d_in = x.shape
    d_in_w, d_out = weight.shape
    assert d_in == d_in_w

    out_scale = float(np.sqrt(1.0 / d_out))
    tm = _choose_tm(N, d_in, d_out, tm_max=tm_max)

    # Pad the batch to a multiple of the row tile (padded rows are discarded).
    n_pad = (-N) % tm
    x_p = jnp.pad(x, ((0, n_pad), (0, 0))) if n_pad else x
    Np = N + n_pad
    grid = (Np // tm,)

    kernel = functools.partial(_rff_kernel, d_out=d_out, out_scale=out_scale)

    out = pl.pallas_call(
        kernel,
        out_shape=jax.ShapeDtypeStruct((Np, 2 * d_out), jnp.float32),
        grid_spec=pltpu.PrefetchScalarGridSpec(
            num_scalar_prefetch=0,
            grid=grid,
            in_specs=[
                pl.BlockSpec(memory_space=pltpu.MemorySpace.SMEM),     # sigma scalar
                pl.BlockSpec((tm, d_in), lambda i: (i, 0)),            # x row tile
                pl.BlockSpec((d_in, d_out), lambda i: (0, 0)),         # full weight
            ],
            out_specs=pl.BlockSpec((tm, 2 * d_out), lambda i: (i, 0)),
        ),
        compiler_params=pltpu.CompilerParams(
            dimension_semantics=("parallel",),
            vmem_limit_bytes=48 * 1024 * 1024,
        ),
    )(sigma, x_p, weight)

    return out[:N] if n_pad else out


def rff_layer_reference(x, weight, sigma):
    d_out = weight.shape[1]
    wx = x @ ((1.0 / sigma[0]) * weight)
    return np.sqrt(1.0 / d_out) * jnp.concatenate(
        [jnp.cos(wx), jnp.sin(wx)], axis=-1)


if __name__ == "__main__":
    # Deterministic parameter init mirroring RFF_tuneable.__init__ shapes:
    #   weight ~ randn([d_in, d_out]), bias ~ 2*pi*rand(d_out) (bias is unused
    #   by the 'cosine_sine' variant), sigma = sigma_init (scalar parameter).
    d_in, d_out = 32, 128
    N = 8

    key = jax.random.PRNGKey(0)
    k_x, k_w, k_b, k_x2 = jax.random.split(key, 4)

    x = jax.random.normal(k_x, (N, d_in), dtype=jnp.float32)
    weight = jax.random.normal(k_w, (d_in, d_out), dtype=jnp.float32)
    bias = 2.0 * np.pi * jax.random.uniform(k_b, (d_out,), dtype=jnp.float32)  # unused ('cosine_sine')
    sigma = jnp.array([1.5], dtype=jnp.float32)  # sigma_init

    out = rff_layer_forward(x, weight, sigma)
    out = jax.block_until_ready(out)
    ref = rff_layer_reference(x, weight, sigma)
    assert out.shape == (N, 2 * d_out)
    np.testing.assert_allclose(np.asarray(out), np.asarray(ref),
                               rtol=1e-4, atol=1e-5)

    # Second check: batch not divisible by 8 / by the row tile (padding path).
    N2 = 37
    x2 = jax.random.normal(k_x2, (N2, d_in), dtype=jnp.float32)
    out2 = jax.block_until_ready(rff_layer_forward(x2, weight, sigma))
    ref2 = rff_layer_reference(x2, weight, sigma)
    assert out2.shape == (N2, 2 * d_out)
    np.testing.assert_allclose(np.asarray(out2), np.asarray(ref2),
                               rtol=1e-4, atol=1e-5)

    print("KERNEL_OK")
</pallas_src>

<mosaic_0001>
module attributes {stable_mosaic.version = 11 : i64} {
  func.func @_rff_kernel(%arg0: i32, %arg1: memref<1xf32, #tpu.memory_space<smem>>, %arg2: memref<8x32xf32, #tpu.memory_space<vmem>>, %arg3: memref<32x128xf32, #tpu.memory_space<vmem>>, %arg4: memref<8x256xf32, #tpu.memory_space<vmem>>) attributes {dimension_semantics = [#tpu.dimension_semantics<parallel>], iteration_bounds = array<i64: 1>, scalar_prefetch = 0 : i64, scratch_operands = 0 : i64, tpu.core_type = #tpu.core_type<tc>, window_params = [{transform_indices = @transform_0, window_bounds = array<i64: 1>}, {transform_indices = @transform_1, window_bounds = array<i64: 8, 32>}, {pipeline_mode = #tpu.pipeline_mode<synchronous>, transform_indices = @transform_2, window_bounds = array<i64: 32, 128>}, {transform_indices = @transform_3, window_bounds = array<i64: 8, 256>}]} {
    %c0 = arith.constant 0 : index
    %0 = memref.load %arg1[%c0] : memref<1xf32, #tpu.memory_space<smem>>
    %cst = arith.constant 1.000000e+00 : f32
    %1 = arith.divf %cst, %0 : f32
    %c0_0 = arith.constant 0 : index
    %c0_1 = arith.constant 0 : index
    %2 = vector.load %arg2[%c0_0, %c0_1] : memref<8x32xf32, #tpu.memory_space<vmem>>, vector<8x32xf32>
    %c0_2 = arith.constant 0 : index
    %c0_3 = arith.constant 0 : index
    %3 = vector.load %arg3[%c0_2, %c0_3] : memref<32x128xf32, #tpu.memory_space<vmem>>, vector<32x128xf32>
    %cst_4 = arith.constant dense<0.000000e+00> : vector<8x128xf32>
    %4 = tpu.matmul %2, %3, %cst_4 {dimension_numbers = #tpu.dot_dimension_numbers<[1], [0], [0], [1], [0, 0, 1, 1], [], []>} : vector<8x32xf32>, vector<32x128xf32>, vector<8x128xf32> -> vector<8x128xf32>
    %5 = vector.broadcast %1 : f32 to vector<8x128xf32>
    %6 = arith.mulf %4, %5 : vector<8x128xf32>
    %7 = math.cos %6 : vector<8x128xf32>
    %cst_5 = arith.constant 0.0883883461 : f32
    %8 = vector.broadcast %cst_5 : f32 to vector<8x128xf32>
    %9 = arith.mulf %8, %7 : vector<8x128xf32>
    %c0_6 = arith.constant 0 : index
    %c0_7 = arith.constant 0 : index
    %10 = vector.load %arg4[%c0_6, %c0_7] : memref<8x256xf32, #tpu.memory_space<vmem>>, vector<8x128xf32>
    tpu.vector_store %arg4[%c0_6, %c0_7], %9 {strides = array<i32>} : memref<8x256xf32, #tpu.memory_space<vmem>>, vector<8x128xf32>,
    %11 = math.sin %6 : vector<8x128xf32>
    %cst_8 = arith.constant 0.0883883461 : f32
    %12 = vector.broadcast %cst_8 : f32 to vector<8x128xf32>
    %13 = arith.mulf %12, %11 : vector<8x128xf32>
    %c0_9 = arith.constant 0 : index
    %c128 = arith.constant 128 : index
    %14 = vector.load %arg4[%c0_9, %c128] : memref<8x256xf32, #tpu.memory_space<vmem>>, vector<8x128xf32>
    tpu.vector_store %arg4[%c0_9, %c128], %13 {strides = array<i32>} : memref<8x256xf32, #tpu.memory_space<vmem>>, vector<8x128xf32>,
    return
  }
  func.func @transform_0(%arg0: i32) -> i32 {
    %c0_i32 = arith.constant 0 : i32
    %c0_i32_0 = arith.constant 0 : i32
    return %c0_i32 : i32
  }
  func.func @transform_1(%arg0: i32) -> (i32, i32) {
    %c0_i32 = arith.constant 0 : i32
    %c0_i32_0 = arith.constant 0 : i32
    return %arg0, %c0_i32 : i32, i32
  }
  func.func @transform_2(%arg0: i32) -> (i32, i32) {
    %c0_i32 = arith.constant 0 : i32
    %c0_i32_0 = arith.constant 0 : i32
    %c0_i32_1 = arith.constant 0 : i32
    return %c0_i32, %c0_i32_0 : i32, i32
  }
  func.func @transform_3(%arg0: i32) -> (i32, i32) {
    %c0_i32 = arith.constant 0 : i32
    %c0_i32_0 = arith.constant 0 : i32
    return %arg0, %c0_i32 : i32, i32
  }
}

</mosaic_0001>

<bundles_post_ra>
// kernel: tpu_custom_call.1
= control target key start
LH: loop header
LB: loop body
LE: loop exit
PB: predicated region body
PF: predicated region fallthrough
CT: control target
= control target key end

     0   :  { %9 = vsyncpa [#allocation4], 0  ;;  %s584_s0 = inlined_call_operand.<no memory space> [shape: f32[1], index: 0, kind: input, shape index: {}]   ;;  %s585_s1 = inlined_call_operand.hbm [shape: f32[8,32], index: 1, kind: input, shape index: {}]   ;;  %s586_s2 = inlined_call_operand.hbm [shape: f32[32,128], index: 2, kind: input, shape index: {}]   ;;  %s587_s3 = inlined_call_operand.hbm [shape: f32[8,256], index: 3, kind: output, shape index: {}]  }
   0x1   :  { %10 = vsyncpa [#allocation7], 0 }
   0x2   :  { %11 = vsyncpa [#allocation5], 0  ;;  %s483_s12 = smov [#allocation3]   ;;  %s484_s14 = smov [#allocation6]  }
   0x3   :  { %s20_s13 = sshll.u32 %s483_s12, 4  ;;  %s29_s15 = sshll.u32 %s484_s14, 4  ;;  %s21_s13 = int_to_ptr.vmem [resolvable:$true] %s20_s13  ;;  %s517_s15 = int_to_ptr.vmem [resolvable:$true] %s29_s15 }
   0x4   :  { %s411_s18 = scalar_lea.hbm %s585_s1, 128 }
   0x5   :  { %p412_p0 = scmp.ne.s32.totalorder %s585_s1, %s411_s18  ;;  %p415_p1 = scmp.lt.u32.totalorder %s411_s18, %s585_s1 }
   0x7   :  { %p417_p2 = pnand %p415_p1, %p412_p0 }
   0x9   :  { %420 = shalt.err (!%p417_p2)
}
   0xa   :  { %s421_s23 = scalar_lea.vmem %s21_s13, 128  ;;  %p426_p4 = scmp.lt.s32.totalorder %s21_s13, %s21_s13 }
   0xb   :  { %p422_p3 = scmp.ne.s32.totalorder %s21_s13, %s421_s23  ;;  %p427_p5 = scmp.lt.s32.totalorder %s421_s23, %s421_s23 }
   0xd   :  { %p428_p6 = por %p427_p5, %p426_p4 }
   0xf   :  { %p429_p7 = pnand %p428_p6, %p422_p3 }
  0x11   :  { %432 = shalt.err (!%p429_p7)
}
  0x12   :  { %23 = dma.hbm_to_vmem [thread:$0]  %s585_s1, 128, %s21_s13, [#allocation4]  }
  0x13   :  { %s433_s28 = scalar_lea.hbm %s586_s2, 512 }
  0x14   :  { %p434_p8 = scmp.ne.s32.totalorder %s586_s2, %s433_s28  ;;  %p437_p9 = scmp.lt.u32.totalorder %s433_s28, %s586_s2 }
  0x16   :  { %p439_p10 = pnand %p437_p9, %p434_p8 }
  0x18   :  { %442 = shalt.err (!%p439_p10)
}
  0x19   :  { %s443_s6 = scalar_lea.vmem %s517_s15, 512  ;;  %p448_p12 = scmp.lt.s32.totalorder %s517_s15, %s517_s15 }
  0x1a   :  { %p444_p11 = scmp.ne.s32.totalorder %s517_s15, %s443_s6  ;;  %p449_p13 = scmp.lt.s32.totalorder %s443_s6, %s443_s6 }
  0x1c   :  { %p450_p0 = por %p449_p13, %p448_p12 }
  0x1e   :  { %p451_p1 = pnand %p450_p0, %p444_p11 }
  0x20   :  { %454 = shalt.err (!%p451_p1)
}
  0x21   :  { %s485_s1 = smov 128   ;;  %s486_s7 = smov 8  }
  0x22   :  { %35 = dma.hbm_to_vmem [thread:$0]  %s586_s2, 512, %s517_s15, [#allocation7], %s485_s1, %s485_s1, %s486_s7  }
  0x23   :  { %477 = dma.done.wait [#allocation4], 128  }
  0x24   :  { %478 = vsyncadd [#allocation4], 4294967168 }
  0x25   :  { %479 = dma.done.wait [#allocation7], 512  }
  0x26   :  { %480 = vsyncadd [#allocation7], 4294966784  ;;  %v487_v0 = vmov 0.0|0.0   ;;  %vm488_vm0 = vmmov 0   ;;  %v489_v1 = vmov 0.0   ;;  %v43_v2 = vstv %s584_s0  ;;  %v47_v3 = vld [vmem:[#allocation6] sm:$0xff] }
  0x27   :  { %379 = vmatprep.subr.bf16.mxu0 %v487_v0  ;;  %376 = vmatprep.mubr.msk.f32.mxu0 %vm488_vm0, %v489_v1  ;;  %405 = vrcp.f32 %v43_v2  ;;  %v48_v4 = vld [vmem:[#allocation6 + $0x8] sm:$0xff]  ;;  %v49_v5 = vld [vmem:[#allocation6 + $0x10] sm:$0xff]  ;;  %v50_v7 = vld [vmem:[#allocation6 + $0x18] sm:$0xff]  ;;  %vm51_vm1 = vcmask 261120   ;;  %v490_v25 = vmov 683565275  }
  0x28   :  { %v380_v6 = vpack.c.bf16 %v48_v4, %v47_v3  ;;  %v383_v8 = vpack.c.bf16 %v50_v7, %v49_v5  ;;  %v46_v10 = vld [vmem:[#allocation3] sm:$0xff]  ;;  %v491_v27 = vmov 2475754826   ;;  %v492_v30 = vmov 2131351028   ;;  %s496_s0 = smov [#allocation8]  }
  0x29   :  { %v493_v33 = vmov 2102212464   ;;  %v494_v36 = vmov 920167782   ;;  %v495_v39 = vmov 1326507024  }
  0x2a   :  { %381 = vmatpush3.bf16.msra.mxu0 %v380_v6  ;;  %s344_s12 = sshll.u32 %s496_s0, 4  ;;  %s345_s12 = int_to_ptr.vmem [resolvable:$true] %s344_s12 }
  0x2b   :  { %382 = vmatprep.subr.bf16.mxu0 %v487_v0  ;;  %s455_s13 = scalar_lea.vmem %s345_s12, 256  ;;  %p460_p3 = scmp.lt.s32.totalorder %s345_s12, %s345_s12 }
  0x2c   :  { %p456_p2 = scmp.ne.s32.totalorder %s345_s12, %s455_s13  ;;  %p461_p4 = scmp.lt.s32.totalorder %s455_s13, %s455_s13 }
  0x2e   :  { %384 = vmatpush3.bf16.msra.mxu0 %v383_v8  ;;  %p462_p5 = por %p461_p4, %p460_p3 }
  0x30   :  { %p463_p6 = pnand %p462_p5, %p456_p2 }
  0x31   :  { %v406_v9 = vpop.eup %405  ;;  %377 = vmatmul.mubr.msk.f32.vlgmr.msra.gmra.mrb[0].mxu0 %vm51_vm1, %v46_v10 }
  0x32   :  { %385 = vpush %v406_v9 }
  0x63   :  { %s386_s2 = spop %385 }
  0x64   :  { %v125_v11 = vstv %s386_s2 }
 0x104   :  { %v121_v12 = vpop.f32.mrb[0].mxu0 }
 0x105   :  { %v551_v13 = vmul.f32 %v125_v11, %v121_v12  ;;  %v378_v14 = vpop.f32.mrb[1].mxu0 }
 0x107   :  { %v130_v15 = vand.u32 2139095040, %v551_v13  ;;  %v127_v19 = vand.u32 2147483647, %v551_v13  ;;  %vm129_vm9 = vcmp.lt.s32.totalorder %v551_v13, 0  ;;  %vm219_vm1 = vweird.f32 %v551_v13 }
 0x109   :  { %v131_v16 = vshrl.u32 %v130_v15, 23  ;;  %v134_v22 = vand.u32 8388607, %v127_v19  ;;  %vm128_vm10 = vcmp.le.f32.partialorder %v127_v19, 0.7853982 }
 0x10b   :  { %v355_v17 = vadd.s32 4294967169, %v131_v16  ;;  %v135_v41 = vor.u32 8388608, %v134_v22 }
 0x10d   :  { %v137_v18 = vadd.s32 1, %v355_v17  ;;  %v175_v55 = vshll.u32 %v135_v41, 8 }
 0x10f   :  { %vm138_vm2 = vcmp.gt.s32.totalorder %v137_v18, 0 }
 0x110   :  { %v139_v20 = vsel %vm138_vm2, %v137_v18, 0 }
 0x111   :  { %v141_v21 = vand.u32 31, %v139_v20  ;;  %v140_v24 = vshrl.u32 %v139_v20, 5 }
 0x113   :  { %v142_v23 = vsub.s32 32, %v141_v21  ;;  %v144_v26 = vshll.u32 %v490_v25, %v141_v21  ;;  %v147_v28 = vshll.u32 %v491_v27, %v141_v21  ;;  %v150_v32 = vshll.u32 %v492_v30, %v141_v21 }
 0x114   :  { %v153_v35 = vshll.u32 %v493_v33, %v141_v21  ;;  %v156_v38 = vshll.u32 %v494_v36, %v141_v21  ;;  %vm159_vm3 = vcmp.lt.s32.totalorder %v140_v24, 1  ;;  %vm162_vm4 = vcmp.lt.s32.totalorder %v140_v24, 4 }
 0x115   :  { %v145_v29 = vshrl.u32 %v491_v27, %v142_v23  ;;  %v148_v31 = vshrl.u32 %v492_v30, %v142_v23  ;;  %v151_v34 = vshrl.u32 %v493_v33, %v142_v23  ;;  %v154_v37 = vshrl.u32 %v494_v36, %v142_v23 }
 0x116   :  { %v157_v40 = vshrl.u32 %v495_v39, %v142_v23  ;;  %v143_v50 = vshrl.u32 %v490_v25, %v142_v23  ;;  %vm161_vm5 = vcmp.lt.s32.totalorder %v140_v24, 3  ;;  %vm160_vm6 = vcmp.lt.s32.totalorder %v140_v24, 2 }
 0x117   :  { %v146_v42 = vor.u32 %v145_v29, %v144_v26  ;;  %v149_v43 = vor.u32 %v148_v31, %v147_v28  ;;  %v152_v44 = vor.u32 %v151_v34, %v150_v32  ;;  %v155_v45 = vor.u32 %v154_v37, %v153_v35 }
 0x118   :  { %v158_v46 = vor.u32 %v157_v40, %v156_v38 }
 0x119   :  { %v164_v47 = vsel %vm162_vm4, %v152_v44, 2102212464  ;;  %v167_v48 = vsel %vm159_vm3, %v146_v42, %v149_v43  ;;  %v171_v49 = vsel %vm159_vm3, %v149_v43, %v152_v44  ;;  %v168_v51 = vsel %vm162_vm4, %v155_v45, 920167782 }
 0x11a   :  { %v172_v52 = vsel %vm162_vm4, %v158_v46, 1326507024  ;;  %v169_v53 = vsel %vm161_vm5, %v152_v44, %v168_v51  ;;  %v163_v56 = vsel %vm159_vm3, %v143_v50, %v146_v42  ;;  %v165_v57 = vsel %vm161_vm5, %v149_v43, %v164_v47 }
 0x11b   :  { %v173_v54 = vsel %vm161_vm5, %v155_v45, %v172_v52  ;;  %v170_v58 = vsel %vm160_vm6, %v167_v48, %v169_v53  ;;  %v166_v0 = vsel %vm160_vm6, %v163_v56, %v165_v57 }
 0x11c   :  { %v174_v59 = vsel %vm160_vm6, %v171_v49, %v173_v54  ;;  %v560_v62 = vmul.u32.u64.low %v175_v55, %v170_v58  ;;  %v561_v63 = vmul.u32.u64.high %v175_v55, %v170_v58, %v560_v62  ;;  %v182_v2 = vmul.u32 %v175_v55, %v166_v0 }
 0x11d   :  { %v557_v60 = vmul.u32.u64.low %v175_v55, %v174_v59  ;;  %v558_v61 = vmul.u32.u64.high %v175_v55, %v174_v59, %v557_v60 }
 0x11e   :  { %v185_v1 = vadd.s32 1, %v561_v63 }
 0x11f   :  { %vm184_vm7 = vc.u32 %v558_v61, %v560_v62  ;;  %v183_v15 = vadd.s32 %v560_v62, %v558_v61 }
 0x120   :  { %v186_v3 = vsel %vm184_vm7, %v185_v1, %v561_v63 }
 0x121   :  { %v187_v4 = vadd.s32 %v186_v3, %v182_v2 }
 0x123   :  { %v188_v5 = vadd.s32 536870912, %v187_v4 }
 0x125   :  { %v189_v6 = vshrl.u32 %v188_v5, 30 }
 0x127   :  { %v190_v7 = vshll.u32 %v189_v6, 30  ;;  %v213_v28 = vsub.s32 4, %v189_v6 }
 0x129   :  { %v191_v8 = vsub.s32 %v187_v4, %v190_v7  ;;  %v214_v31 = vsel %vm129_vm9, %v213_v28, %v189_v6 }
 0x12a   :  { %v216_v33 = vsel %vm128_vm10, 0, %v214_v31 }
 0x12b   :  { %v193_v9 = vsub.s32 0, %v191_v8  ;;  %v325_v34 = vadd.s32 3, %v216_v33  ;;  %v220_v35 = vand.u32 3, %v216_v33 }
 0x12d   :  { %v356_v10 = vmin.u32 %v193_v9, %v191_v8  ;;  %v326_v36 = vand.u32 3, %v325_v34  ;;  %vm225_vm11 = vcmp.eq.s32.totalorder %v220_v35, 2  ;;  %vm222_vm13 = vcmp.eq.s32.totalorder %v220_v35, 0 }
 0x12e   :  { %vm221_vm15 = vcmp.lt.s32.totalorder %v220_v35, 2 }
 0x12f   :  { %v195_v11 = vclz %v356_v10  ;;  %vm331_vm12 = vcmp.eq.s32.totalorder %v326_v36, 2  ;;  %vm328_vm14 = vcmp.eq.s32.totalorder %v326_v36, 0  ;;  %vm327_vm0 = vcmp.lt.s32.totalorder %v326_v36, 2 }
 0x131   :  { %v357_v12 = vadd.s32 4294967294, %v195_v11 }
 0x133   :  { %vm358_vm8 = vcmp.lt.s32.totalorder %v357_v12, 0 }
 0x134   :  { %v198_v14 = vsel %vm358_vm8, 0, %v357_v12 }
 0x135   :  { %v199_v16 = vsub.s32 32, %v198_v14  ;;  %v203_v17 = vsub.s32 4294967266, %v198_v14  ;;  %v200_v18 = vshll.u32 %v191_v8, %v198_v14 }
 0x137   :  { %v201_v20 = vshrl.u32 %v183_v15, %v199_v16  ;;  %v204_v21 = vadd.s32 127, %v203_v17 }
 0x139   :  { %v202_v22 = vor.u32 %v201_v20, %v200_v18  ;;  %v205_v23 = vshll.u32 %v204_v21, 23 }
 0x13b   :  { %v206_v24 = vor.u32 4788187, %v205_v23  ;;  %v209_v26 = vcvt.s32.f32 %v202_v22 }
 0x13d   :  { %v207_v25 = vand.u32 2147483647, %v206_v24 }
 0x13f   :  { %v210_v27 = vmul.f32 %v209_v26, %v207_v25 }
 0x141   :  { %v211_v29 = vxor.u32 2147483648, %v210_v27 }
 0x143   :  { %v212_v30 = vsel %vm129_vm9, %v211_v29, %v210_v27 }
 0x144   :  { %v215_v32 = vsel %vm128_vm10, %v551_v13, %v212_v30 }
 0x145   :  { %407 = vcosq.f32 %v215_v32 }
 0x146   :  { %409 = vsinq.f32 %v215_v32 }
 0x14f   :  { %v408_v37 = vpop.eup %407 }
 0x150   :  { %v410_v38 = vpop.eup %409  ;;  %v226_v39 = vxor.u32 2147483648, %v408_v37 }
 0x151   :  { %v223_v40 = vxor.u32 2147483648, %v410_v38 }
 0x152   :  { %v227_v41 = vsel %vm225_vm11, %v226_v39, %v410_v38  ;;  %v333_v19 = vsel %vm331_vm12, %v226_v39, %v410_v38 }
 0x153   :  { %v224_v42 = vsel %vm222_vm13, %v408_v37, %v223_v40  ;;  %v330_v43 = vsel %vm328_vm14, %v408_v37, %v223_v40 }
 0x154   :  { %v228_v44 = vsel %vm221_vm15, %v224_v42, %v227_v41  ;;  %v334_v45 = vsel %vm327_vm0, %v330_v43, %v333_v19 }
 0x155   :  { %v229_v46 = vsel %vm219_vm1, nan, %v228_v44  ;;  %v335_v47 = vsel %vm219_vm1, nan, %v334_v45 }
 0x156   :  { %v230_v48 = vmul.f32 0.088388346, %v229_v46  ;;  %v336_v49 = vmul.f32 0.088388346, %v335_v47 }
 0x158   :  { %231 = vst [vmem:[#allocation8] sm:$0xff] %v230_v48  ;;  %337 = vst [vmem:[#allocation8 + $0x8] sm:$0xff] %v336_v49 }
 0x159   :  { %466 = shalt.err (!%p463_p6)
}
 0x15a   :  { %s467_s16 = scalar_lea.hbm %s587_s3, 256 }
 0x15b   :  { %p468_p7 = scmp.ne.s32.totalorder %s587_s3, %s467_s16  ;;  %p471_p8 = scmp.lt.u32.totalorder %s467_s16, %s587_s3 }
 0x15d   :  { %p473_p9 = pnand %p471_p8, %p468_p7 }
 0x15f   :  { %476 = shalt.err (!%p473_p9)
}
 0x160   :  { %347 = dma.vmem_to_hbm [thread:$0]  %s345_s12, 256, %s587_s3, [#allocation5]  }
 0x161   :  { %481 = dma.done.wait [#allocation5], 256  }
 0x162   :  { %482 = vsyncadd [#allocation5], 4294967040 }
 0x163   :  { %351 = vsyncpa [#allocation4], 1 }
 0x164   :  { %352 = vsyncpa [#allocation7], 1 }
 0x165   :  { %353 = vsyncpa [#allocation5], 1 }

</bundles_post_ra>
